<compile_context>
chip_gen: v6e
topology: v6e:2x2x1
jax: 0.10.0
libtpu: 0.0.40
codegen_flags: <defaults>
</compile_context>

<pallas_src>
import functools

import jax
import jax.numpy as jnp
from jax import lax
from jax.experimental import pallas as pl
from jax.experimental.pallas import tpu as pltpu


# ---------------------------------------------------------------------------
# Kernels
# ---------------------------------------------------------------------------

def _ce_rows_kernel(logits_ref, tgt_ref, mask_ref, out_ref, *, n_valid_rows):
    """dim_last=True layout: rows on sublanes, classes on lanes.

    logits_ref: (R, C) native dtype        tgt_ref/mask_ref: (1, R) lane-dense
    out_ref:    (8, 128) f32 -- per-tile partial sum, splatted
    """
    x = logits_ref[...]                                     # (R, C) native
    r_dim, c_dim = x.shape

    # Lane-dense side inputs -> per-row (sublane) orientation.  Cheap R-element
    # relayout in-register; keeps the HBM arrays compact and the DMA full-width.
    tgt = tgt_ref[...].reshape(r_dim, 1)                    # (R, 1) int32
    mask = mask_ref[...].reshape(r_dim, 1)                  # (R, 1) f32

    # Max + target-logit gather in native dtype (both exact, half the VPU work
    # for bf16); the iota is (1, C) and broadcast by the compare.
    row_max = jnp.max(x, axis=-1, keepdims=True)            # (R, 1) native
    col = lax.broadcasted_iota(jnp.int32, (1, c_dim), 1)    # (1, C)
    tgt_logit = jnp.sum(jnp.where(col == tgt, x, 0),
                        axis=-1, keepdims=True)             # (R, 1) exact

    # Subtract / exp / log stay in f32 so bf16 inputs match an f32 reference.
    xf = x.astype(jnp.float32)
    mxf = row_max.astype(jnp.float32)
    lse = jnp.log(jnp.sum(jnp.exp(xf - mxf), axis=-1, keepdims=True))   # (R,1)
    per_row = lse + (mxf - tgt_logit.astype(jnp.float32))               # (R,1)

    # Drop only genuinely-undefined rows (partial tail block).  Valid rows keep
    # reference semantics: NaN/Inf losses and negative masks propagate.
    row0 = pl.program_id(0) * r_dim
    rid = lax.broadcasted_iota(jnp.int32, (r_dim, 1), 0) + row0
    contrib = jnp.where(rid < n_valid_rows, per_row * mask, 0.0)        # (R,1)

    tile_sum = jnp.sum(contrib, axis=0, keepdims=True)                  # (1,1)
    out_ref[...] = jnp.broadcast_to(tile_sum, out_ref.shape)


def _ce_cols_kernel(logits_ref, tgt_ref, mask_ref, out_ref, *, n_valid_cols):
    """dim_last=False layout: classes on sublanes, time on lanes (no wrapper
    transpose needed; target/mask are naturally lane-dense here).

    logits_ref: (C, Tt) native dtype       tgt_ref/mask_ref: (1, Tt)
    out_ref:    (8, 128) f32
    """
    x = logits_ref[...]                                     # (C, Tt) native
    c_dim, t_dim = x.shape
    tgt = tgt_ref[...]                                      # (1, Tt) int32
    mask = mask_ref[...]                                    # (1, Tt) f32

    col_max = jnp.max(x, axis=0, keepdims=True)             # (1, Tt) native
    cls = lax.broadcasted_iota(jnp.int32, (c_dim, 1), 0)    # (C, 1)
    tgt_logit = jnp.sum(jnp.where(cls == tgt, x, 0),
                        axis=0, keepdims=True)              # (1, Tt) exact

    xf = x.astype(jnp.float32)
    mxf = col_max.astype(jnp.float32)
    lse = jnp.log(jnp.sum(jnp.exp(xf - mxf), axis=0, keepdims=True))    # (1,Tt)
    per_row = lse + (mxf - tgt_logit.astype(jnp.float32))               # (1,Tt)

    t0 = pl.program_id(1) * t_dim
    tid = lax.broadcasted_iota(jnp.int32, (1, t_dim), 1) + t0
    contrib = jnp.where(tid < n_valid_cols, per_row * mask, 0.0)        # (1,Tt)

    tile_sum = jnp.sum(contrib, axis=1, keepdims=True)                  # (1,1)
    out_ref[...] = jnp.broadcast_to(tile_sum, out_ref.shape)


# ---------------------------------------------------------------------------
# Wrapper
# ---------------------------------------------------------------------------

def _round_up(x, m):
    return (x + m - 1) // m * m


def _vmem_limit_bytes():
    try:
        cap = int(pltpu.get_tpu_info().vmem_capacity_bytes)
    except Exception:
        cap = 64 * 1024 * 1024          # v7x-sized fallback, safe on all gens
    # ~75% of physical, capped so v5e/v6e stay at a comfortable 96 MiB.
    return min(cap * 3 // 4, 96 * 1024 * 1024)


def _auto_tile(n_rows, n_classes, itemsize, vmem_limit):
    """Row-tile sized from DMA pair + in-kernel f32 temporaries (review #3/#4)."""
    # Per row: 2 double-buffered native copies of the logits tile plus ~3 live
    # f32-width temporaries (upcast/sub, exp, one-hot select) inside the body.
    per_row = n_classes * (2 * itemsize + 12) + 64
    budget = (vmem_limit * 7) // 10
    t = budget // max(per_row, 1)
    t = min(int(t), 2048, _round_up(n_rows, 128))
    t = max(128, t)                      # 128 keeps side blocks lane-aligned
    return (t // 128) * 128
    # TODO(synk): for class counts so large that even 128 rows exceed the VMEM
    # budget, a class-axis grid with an online (flash-style) logsumexp is
    # needed; not required for these shapes.


@functools.partial(jax.jit, static_argnames=("dim_last", "row_tile"))
def multi_cross_entropy_loss(inputs, target, loss_mask, dim_last=True,
                             row_tile=None):
    """JAX/Pallas equivalent of MultiCrossEntropyLoss.forward.

    inputs:    (H, B, T, C) if dim_last else (H, B, C, T)  -- float logits
    target:    (B, T, H) integer class indices
    loss_mask: (B, T) float
    Returns a scalar float32 loss.
    """
    # The reference returns inside the first loop iteration -> head 0 only.
    logits0 = inputs[0]
    tgt0 = target[..., 0].astype(jnp.int32)
    mask0 = loss_mask.astype(jnp.float32)
    itemsize = jnp.dtype(logits0.dtype).itemsize
    vmem_limit = _vmem_limit_bytes()

    if dim_last:
        B, T, C = logits0.shape
        N = B * T
        logits2d = logits0.reshape(N, C)             # free collapse, no copy
        tile = row_tile or _auto_tile(N, C, itemsize, vmem_limit)
        nt = pl.cdiv(N, tile)
        n_pad = nt * tile
        # Only the tiny side inputs are padded; lane-dense (1, N_pad) layout.
        tgt_flat = jnp.pad(tgt0.reshape(-1), (0, n_pad - N)).reshape(1, n_pad)
        mask_flat = jnp.pad(mask0.reshape(-1), (0, n_pad - N)).reshape(1, n_pad)

        cost = pl.CostEstimate(flops=int(6 * N * C),
                               transcendentals=int(N * C),
                               bytes_accessed=int(N * C * itemsize + 8 * N
                                                  + 4096 * nt))
        partials = pl.pallas_call(
            functools.partial(_ce_rows_kernel, n_valid_rows=N),
            out_shape=jax.ShapeDtypeStruct((8, 128 * nt), jnp.float32),
            grid=(nt,),
            in_specs=[
                pl.BlockSpec((tile, C), lambda i: (i, 0)),
                pl.BlockSpec((1, tile), lambda i: (0, i)),
                pl.BlockSpec((1, tile), lambda i: (0, i)),
            ],
            out_specs=pl.BlockSpec((8, 128), lambda i: (0, i)),
            compiler_params=pltpu.CompilerParams(
                dimension_semantics=("parallel",),
                vmem_limit_bytes=vmem_limit),
            cost_estimate=cost,
        )(logits2d, tgt_flat, mask_flat)
        num_blocks = nt
    else:
        # (B, C, T) consumed directly: classes on sublanes, time on lanes.
        B, C, T = logits0.shape
        N = B * T
        tile = row_tile or _auto_tile(T, C, itemsize, vmem_limit)
        nt = pl.cdiv(T, tile)
        t_pad = nt * tile
        tgt_flat = jnp.pad(tgt0, ((0, 0), (0, t_pad - T))).reshape(1, B * t_pad)
        mask_flat = jnp.pad(mask0, ((0, 0), (0, t_pad - T))).reshape(1, B * t_pad)

        cost = pl.CostEstimate(flops=int(6 * N * C),
                               transcendentals=int(N * C),
                               bytes_accessed=int(N * C * itemsize + 8 * N
                                                  + 4096 * B * nt))
        partials = pl.pallas_call(
            functools.partial(_ce_cols_kernel, n_valid_cols=T),
            out_shape=jax.ShapeDtypeStruct((8, 128 * B * nt), jnp.float32),
            grid=(B, nt),
            in_specs=[
                pl.BlockSpec((None, C, tile), lambda b, t: (b, 0, t)),
                pl.BlockSpec((1, tile), lambda b, t: (0, b * nt + t)),
                pl.BlockSpec((1, tile), lambda b, t: (0, b * nt + t)),
            ],
            out_specs=pl.BlockSpec((8, 128), lambda b, t: (0, b * nt + t)),
            compiler_params=pltpu.CompilerParams(
                dimension_semantics=("parallel", "parallel"),
                vmem_limit_bytes=vmem_limit),
            cost_estimate=cost,
        )(logits0, tgt_flat, mask_flat)
        num_blocks = B * nt

    # Tiny final reductions in plain XLA (overlappable thanks to CostEstimate).
    loss_sum = jnp.sum(partials.reshape(8, num_blocks, 128)[0, :, 0])
    mask_sum = jnp.sum(mask0)

    # TODO(synk): nn.CrossEntropyLoss kwargs (class weights, ignore_index,
    # label_smoothing) are not modeled; the reference uses defaults.
    return (loss_sum / mask_sum).astype(jnp.float32)


# ---------------------------------------------------------------------------
# Pure-JAX reference & self-test
# ---------------------------------------------------------------------------

def _reference(inputs, target, loss_mask, dim_last=True):
    logits0 = inputs[0]
    if not dim_last:
        logits0 = jnp.transpose(logits0, (0, 2, 1))
    logp = jax.nn.log_softmax(logits0.astype(jnp.float32), axis=-1)   # (B,T,C)
    tgt = target[..., 0]
    picked = jnp.take_along_axis(logp, tgt[..., None], axis=-1)[..., 0]
    loss = -picked * loss_mask
    return jnp.sum(loss) / jnp.sum(loss_mask)


if __name__ == "__main__":
    key = jax.random.PRNGKey(0)
    k1, k2, k3, k4, k5, k6 = jax.random.split(key, 6)

    # Case 1: f32 logits, dim_last=True.
    H, B, T, C = 2, 2, 16, 32        # heads, batch, sequence, num classes
    inputs = jax.random.normal(k1, (H, B, T, C), dtype=jnp.float32)
    target = jax.random.randint(k2, (B, T, H), 0, C, dtype=jnp.int32)
    loss_mask = (jax.random.uniform(k3, (B, T)) > 0.3).astype(jnp.float32)

    out = jax.block_until_ready(
        multi_cross_entropy_loss(inputs, target, loss_mask, dim_last=True))
    ref = _reference(inputs, target, loss_mask, dim_last=True)
    assert jnp.allclose(out, ref, atol=1e-5, rtol=1e-5), (out, ref)

    # Case 2: dim_last=False path (channels-before-sequence, no wrapper transpose).
    inputs_nct = jnp.transpose(inputs, (0, 1, 3, 2))   # (H, B, C, T)
    out2 = jax.block_until_ready(
        multi_cross_entropy_loss(inputs_nct, target, loss_mask, dim_last=False))
    assert jnp.allclose(out2, ref, atol=1e-5, rtol=1e-5), (out2, ref)

    # Case 3: bf16 logits, N not a multiple of the row tile (partial tail
    # block + in-kernel validity masking path).
    B3, T3 = 2, 13                   # N = 26
    inputs3 = jax.random.normal(k4, (H, B3, T3, C), dtype=jnp.float32
                                ).astype(jnp.bfloat16)
    target3 = jax.random.randint(k5, (B3, T3, H), 0, C, dtype=jnp.int32)
    mask3 = (jax.random.uniform(k6, (B3, T3)) > 0.3).astype(jnp.float32)

    out3 = jax.block_until_ready(
        multi_cross_entropy_loss(inputs3, target3, mask3, dim_last=True))
    ref3 = _reference(inputs3, target3, mask3, dim_last=True)
    assert jnp.allclose(out3, ref3, atol=1e-4, rtol=1e-4), (out3, ref3)

    print("KERNEL_OK")
</pallas_src>

<mosaic_0001>
module attributes {stable_mosaic.version = 11 : i64} {
  func.func @_ce_rows_kernel(%arg0: i32, %arg1: memref<128x32xf32, #tpu.memory_space<vmem>>, %arg2: memref<1x128xi32, #tpu.memory_space<vmem>>, %arg3: memref<1x128xf32, #tpu.memory_space<vmem>>, %arg4: memref<8x128xf32, #tpu.memory_space<vmem>>) attributes {dimension_semantics = [#tpu.dimension_semantics<parallel>], iteration_bounds = array<i64: 1>, scalar_prefetch = 0 : i64, scratch_operands = 0 : i64, tpu.core_type = #tpu.core_type<tc>, window_params = [{transform_indices = @transform_0, window_bounds = array<i64: 128, 32>}, {transform_indices = @transform_1, window_bounds = array<i64: 1, 128>}, {transform_indices = @transform_2, window_bounds = array<i64: 1, 128>}, {transform_indices = @transform_3, window_bounds = array<i64: 8, 128>}]} {
    %c0 = arith.constant 0 : index
    %c0_0 = arith.constant 0 : index
    %0 = vector.load %arg1[%c0, %c0_0] : memref<128x32xf32, #tpu.memory_space<vmem>>, vector<128x32xf32>
    %c0_1 = arith.constant 0 : index
    %c0_2 = arith.constant 0 : index
    %1 = vector.load %arg2[%c0_1, %c0_2] : memref<1x128xi32, #tpu.memory_space<vmem>>, vector<1x128xi32>
    %2 = vector.shape_cast %1 : vector<1x128xi32> to vector<128x1xi32>
    %c0_3 = arith.constant 0 : index
    %c0_4 = arith.constant 0 : index
    %3 = vector.load %arg3[%c0_3, %c0_4] : memref<1x128xf32, #tpu.memory_space<vmem>>, vector<1x128xf32>
    %4 = vector.shape_cast %3 : vector<1x128xf32> to vector<128x1xf32>
    %cst = arith.constant dense<0xFF800000> : vector<128xf32>
    %5 = vector.multi_reduction <maximumf>, %0, %cst [1] : vector<128x32xf32> to vector<128xf32>
    %6 = vector.shape_cast %5 : vector<128xf32> to vector<128x1xf32>
    %7 = tpu.iota {dimensions = array<i32: 1>} : vector<1x32xi32>
    %8 = vector.broadcast %7 : vector<1x32xi32> to vector<128x32xi32>
    %9 = vector.broadcast %2 : vector<128x1xi32> to vector<128x32xi32>
    %10 = arith.cmpi eq, %8, %9 : vector<128x32xi32>
    %c0_i32 = arith.constant 0 : i32
    %11 = arith.sitofp %c0_i32 : i32 to f32
    %12 = vector.broadcast %11 : f32 to vector<128x32xf32>
    %13 = arith.select %10, %0, %12 : vector<128x32xi1>, vector<128x32xf32>
    %cst_5 = arith.constant dense<0.000000e+00> : vector<128xf32>
    %14 = vector.multi_reduction <add>, %13, %cst_5 [1] : vector<128x32xf32> to vector<128xf32>
    %15 = vector.shape_cast %14 : vector<128xf32> to vector<128x1xf32>
    %16 = vector.broadcast %6 : vector<128x1xf32> to vector<128x32xf32>
    %17 = arith.subf %0, %16 : vector<128x32xf32>
    %18 = math.exp %17 : vector<128x32xf32>
    %cst_6 = arith.constant dense<0.000000e+00> : vector<128xf32>
    %19 = vector.multi_reduction <add>, %18, %cst_6 [1] : vector<128x32xf32> to vector<128xf32>
    %20 = vector.shape_cast %19 : vector<128xf32> to vector<128x1xf32>
    %21 = math.log %20 : vector<128x1xf32>
    %22 = arith.subf %6, %15 : vector<128x1xf32>
    %23 = arith.addf %21, %22 : vector<128x1xf32>
    %c128_i32 = arith.constant 128 : i32
    %24 = arith.muli %arg0, %c128_i32 : i32
    %25 = tpu.iota {dimensions = array<i32: 0>} : vector<128x1xi32>
    %26 = vector.broadcast %24 : i32 to vector<128x1xi32>
    %27 = arith.addi %25, %26 : vector<128x1xi32>
    %c32_i32 = arith.constant 32 : i32
    %28 = vector.broadcast %c32_i32 : i32 to vector<128x1xi32>
    %29 = arith.cmpi slt, %27, %28 : vector<128x1xi32>
    %30 = arith.mulf %23, %4 : vector<128x1xf32>
    %cst_7 = arith.constant 0.000000e+00 : f32
    %31 = vector.broadcast %cst_7 : f32 to vector<128x1xf32>
    %32 = arith.select %29, %30, %31 : vector<128x1xi1>, vector<128x1xf32>
    %cst_8 = arith.constant dense<0.000000e+00> : vector<1xf32>
    %33 = vector.multi_reduction <add>, %32, %cst_8 [0] : vector<128x1xf32> to vector<1xf32>
    %34 = vector.shape_cast %33 : vector<1xf32> to vector<1x1xf32>
    %35 = vector.shape_cast %34 : vector<1x1xf32> to vector<1x1xf32>
    %36 = vector.broadcast %35 : vector<1x1xf32> to vector<8x128xf32>
    %c0_9 = arith.constant 0 : index
    %c0_10 = arith.constant 0 : index
    %37 = vector.load %arg4[%c0_9, %c0_10] : memref<8x128xf32, #tpu.memory_space<vmem>>, vector<8x128xf32>
    tpu.vector_store %arg4[%c0_9, %c0_10], %36 {strides = array<i32>} : memref<8x128xf32, #tpu.memory_space<vmem>>, vector<8x128xf32>,
    return
  }
  func.func @transform_0(%arg0: i32) -> (i32, i32) {
    %c0_i32 = arith.constant 0 : i32
    %c0_i32_0 = arith.constant 0 : i32
    return %arg0, %c0_i32 : i32, i32
  }
  func.func @transform_1(%arg0: i32) -> (i32, i32) {
    %c0_i32 = arith.constant 0 : i32
    %c0_i32_0 = arith.constant 0 : i32
    return %c0_i32, %arg0 : i32, i32
  }
  func.func @transform_2(%arg0: i32) -> (i32, i32) {
    %c0_i32 = arith.constant 0 : i32
    %c0_i32_0 = arith.constant 0 : i32
    return %c0_i32, %arg0 : i32, i32
  }
  func.func @transform_3(%arg0: i32) -> (i32, i32) {
    %c0_i32 = arith.constant 0 : i32
    %c0_i32_0 = arith.constant 0 : i32
    return %c0_i32, %arg0 : i32, i32
  }
}

</mosaic_0001>

<bundles_post_ra>
// kernel: squeeze.4
= control target key start
LH: loop header
LB: loop body
LE: loop exit
PB: predicated region body
PF: predicated region fallthrough
CT: control target
= control target key end

     0   :  { %vm8_vm0 = vcmask 130048   ;;  %vm14_vm1 = vcmask 261248   ;;  %s42_s0 = inlined_call_operand.vmem [shape: s32[2,16], index: 0, kind: input, shape index: {}]   ;;  %s43_s1 = inlined_call_operand.vmem [shape: s32[32], index: 1, kind: output, shape index: {}]  }
   0x1   :  { %v5_v0 = vld [vmem:[%s42_s0] sm:$0x3]  ;;  %s25_s0 = smov 16  }
   0x2   :  { %6 = vst [vmem:[#allocation1] sm:$0x3] %v5_v0 }
   0x9   :  { %v11_v1 = vld [vmem:[#allocation1 + $0x1] sm:$0x1]   ;;  %v7_v2 = vld [vmem:[#allocation1] sm:$0x1]  }
   0xa   :  { %12 = vrot.lane.b32.xlu0 %v11_v1, %s25_s0  ;;  %9 = vst.msk [vmem:[#allocation0] sm:$0x1] %vm8_vm0, %v7_v2  }
  0x7c   :  { %v13_v3 = vpop.permute.xlu0 %12  }
  0x7d   :  { %15 = vst.msk [vmem:[#allocation0] sm:$0x1] %vm14_vm1, %v13_v3  }
  0x84   :  { %v20_v4 = vld [vmem:[#allocation0] sm:$0x1] }
  0x85   :  { %23 = vst [vmem:[%s43_s1] sm:$0x1] %v20_v4 }

// kernel: multi_cross_entropy_loss.1
= control target key start
LH: loop header
LB: loop body
LE: loop exit
PB: predicated region body
PF: predicated region fallthrough
CT: control target
= control target key end

     0   :  { %vm166_vm0 = vcmask 261120   ;;  %v215_v13 = vlaneseq  ;;  %s653_s0 = inlined_call_operand.vmem [shape: f32[32,32], index: 0, kind: input, shape index: {}]   ;;  %s654_s1 = inlined_call_operand.vmem [shape: s32[1,128], index: 1, kind: input, shape index: {}]   ;;  %s655_s2 = inlined_call_operand.vmem [shape: f32[1,128], index: 2, kind: input, shape index: {}]   ;;  %s656_s3 = inlined_call_operand.vmem [shape: f32[8,128], index: 3, kind: output, shape index: {}]  }
   0x1   :  { %v16_v0 = vld [vmem:[%s653_s0 + $0x10] sm:$0xff]  ;;  %v14_v1 = vld [vmem:[%s653_s0] sm:$0xff]  ;;  %v17_v2 = vld [vmem:[%s653_s0 + $0x18] sm:$0xff] }
   0x2   :  { %v173_v3 = vsel %vm166_vm0, %v16_v0, -inf  ;;  %v167_v4 = vsel %vm166_vm0, %v14_v1, -inf  ;;  %v15_v5 = vld [vmem:[%s653_s0 + $0x8] sm:$0xff]  ;;  %v176_v6 = vsel %vm166_vm0, %v17_v2, -inf  ;;  %v566_v8 = vld [vmem:[%s654_s1] ss:$0 sm:$0xff] }
   0x3   :  { %174 = vmax.xlane.f32.xlu1 %v173_v3  ;;  %168 = vmax.xlane.f32.xlu0 %v167_v4  ;;  %v170_v7 = vsel %vm166_vm0, %v15_v5, -inf  ;;  %v216_v20 = vand.u32 127, %v215_v13  ;;  %v567_v43 = vld [vmem:[%s655_s2] ss:$0 sm:$0xff] }
   0x7   :  { %177 = vmax.xlane.f32.xlu1 %v176_v6  ;;  %171 = vmax.xlane.f32.xlu0 %v170_v7 }
  0x18   :  { %40 = vbcast.lane.b32.xlu1 %v566_v8, 264 }
  0x1c   :  { %44 = vbcast.lane.b32.xlu1 %v566_v8, 272 }
  0x1d   :  { %36 = vbcast.lane.b32.xlu0 %v566_v8, 256 }
  0x20   :  { %48 = vbcast.lane.b32.xlu1 %v566_v8, 280 }
  0x8c   :  { %v623_v9 = vpop.xlane.xlu1 %174  ;;  %v625_v10 = vpop.xlane.xlu0 %168 }
  0x8d   :  { %v299_v11 = vsub.f32 %v16_v0, %v623_v9  ;;  %v297_v12 = vsub.f32 %v14_v1, %v625_v10 }
  0x8f   :  { %v313_v14 = vmul.f32 1.442695, %v297_v12  ;;  %v317_v15 = vmul.f32 1.442695, %v299_v11 }
  0x90   :  { %v629_v16 = vpop.xlane.xlu1 %177  ;;  %v631_v17 = vpop.xlane.xlu0 %171 }
  0x91   :  { %v300_v18 = vsub.f32 %v17_v2, %v629_v16  ;;  %v298_v19 = vsub.f32 %v15_v5, %v631_v17  ;;  %568 = vpow2.f32 %v313_v14 }
  0x92   :  { %570 = vpow2.f32 %v317_v15 }
  0x93   :  { %v315_v21 = vmul.f32 1.442695, %v298_v19  ;;  %v319_v22 = vmul.f32 1.442695, %v300_v18 }
  0x94   :  { %v41_v23 = vpop.permute.xlu1 %40  ;;  %v37_v24 = vpop.permute.xlu0 %36 }
  0x95   :  { %vm218_vm1 = vcmp.eq.s32.totalorder %v216_v20, %v41_v23  ;;  %vm217_vm2 = vcmp.eq.s32.totalorder %v216_v20, %v37_v24  ;;  %572 = vpow2.f32 %v315_v21 }
  0x96   :  { %v234_v25 = vsel %vm218_vm1, %v15_v5, 0.0  ;;  %v233_v26 = vsel %vm217_vm2, %v14_v1, 0.0  ;;  %574 = vpow2.f32 %v319_v22 }
  0x97   :  { %v252_v27 = vsel %vm166_vm0, %v234_v25, 0.0  ;;  %v249_v28 = vsel %vm166_vm0, %v233_v26, 0.0 }
  0x98   :  { %v45_v29 = vpop.permute.xlu1 %44  ;;  %253 = vadd.xlane.f32.xlu1 %v252_v27  ;;  %250 = vadd.xlane.f32.xlu0 %v249_v28 }
  0x99   :  { %vm219_vm3 = vcmp.eq.s32.totalorder %v216_v20, %v45_v29 }
  0x9a   :  { %v235_v30 = vsel %vm219_vm3, %v16_v0, 0.0 }
  0x9b   :  { %v255_v31 = vsel %vm166_vm0, %v235_v30, 0.0 }
  0x9c   :  { %v49_v32 = vpop.permute.xlu1 %48  ;;  %256 = vadd.xlane.f32.xlu0 %v255_v31 }
  0x9d   :  { %vm220_vm4 = vcmp.eq.s32.totalorder %v216_v20, %v49_v32 }
  0x9e   :  { %v236_v33 = vsel %vm220_vm4, %v17_v2, 0.0  ;;  %v569_v34 = vpop.eup %568 }
  0x9f   :  { %v258_v35 = vsel %vm166_vm0, %v236_v33, 0.0  ;;  %v345_v36 = vsel %vm166_vm0, %v569_v34, 0.0  ;;  %v571_v37 = vpop.eup %570 }
  0xa0   :  { %259 = vadd.xlane.f32.xlu1 %v258_v35  ;;  %346 = vadd.xlane.f32.xlu0 %v345_v36  ;;  %v351_v40 = vsel %vm166_vm0, %v571_v37, 0.0 }
  0xa2   :  { %v573_v38 = vpop.eup %572 }
  0xa3   :  { %v348_v39 = vsel %vm166_vm0, %v573_v38, 0.0  ;;  %v575_v41 = vpop.eup %574 }
  0xa4   :  { %349 = vadd.xlane.f32.xlu1 %v348_v39  ;;  %352 = vadd.xlane.f32.xlu0 %v351_v40  ;;  %v354_v42 = vsel %vm166_vm0, %v575_v41, 0.0 }
  0xa8   :  { %355 = vadd.xlane.f32.xlu0 %v354_v42 }
  0xb5   :  { %108 = vbcast.lane.b32.xlu1 %v567_v43, 264 }
  0xb9   :  { %112 = vbcast.lane.b32.xlu1 %v567_v43, 272 }
  0xbd   :  { %116 = vbcast.lane.b32.xlu1 %v567_v43, 280 }
  0xbe   :  { %104 = vbcast.lane.b32.xlu0 %v567_v43, 256 }
 0x121   :  { %v251_v44 = vpop.xlane.xlu0 %250  ;;  %v254_v45 = vpop.xlane.xlu1 %253 }
 0x122   :  { %v425_v55 = vsub.f32 %v625_v10, %v251_v44  ;;  %v426_v59 = vsub.f32 %v631_v17, %v254_v45 }
 0x125   :  { %v257_v46 = vpop.xlane.xlu0 %256 }
 0x126   :  { %v427_v62 = vsub.f32 %v623_v9, %v257_v46 }
 0x129   :  { %v260_v47 = vpop.xlane.xlu1 %259  ;;  %v347_v48 = vpop.xlane.xlu0 %346 }
 0x12a   :  { %576 = vlog2.f32 %v347_v48  ;;  %v428_v4 = vsub.f32 %v629_v16, %v260_v47 }
 0x12d   :  { %v350_v49 = vpop.xlane.xlu1 %349  ;;  %v353_v50 = vpop.xlane.xlu0 %352 }
 0x12e   :  { %578 = vlog2.f32 %v350_v49 }
 0x12f   :  { %580 = vlog2.f32 %v353_v50 }
 0x131   :  { %v356_v51 = vpop.xlane.xlu0 %355  ;;  %v109_v52 = vpop.permute.xlu1 %108 }
 0x132   :  { %582 = vlog2.f32 %v356_v51 }
 0x135   :  { %v113_v57 = vpop.permute.xlu1 %112  ;;  %v105_v0 = vpop.permute.xlu0 %104 }
 0x137   :  { %v577_v53 = vpop.eup %576 }
 0x138   :  { %v394_v54 = vmul.f32 0.6931472, %v577_v53 }
 0x139   :  { %v117_v8 = vpop.permute.xlu1 %116 }
 0x13a   :  { %v441_v61 = vadd.f32 %v425_v55, %v394_v54 }
 0x13b   :  { %v579_v56 = vpop.eup %578 }
 0x13c   :  { %v581_v58 = vpop.eup %580  ;;  %v396_v60 = vmul.f32 0.6931472, %v579_v56  ;;  %v508_v7 = vmul.f32 %v441_v61, %v105_v0 }
 0x13d   :  { %v398_v63 = vmul.f32 0.6931472, %v581_v58 }
 0x13e   :  { %v442_v1 = vadd.f32 %v426_v59, %v396_v60 }
 0x13f   :  { %v583_v2 = vpop.eup %582  ;;  %v443_v3 = vadd.f32 %v427_v62, %v398_v63 }
 0x140   :  { %v400_v5 = vmul.f32 0.6931472, %v583_v2  ;;  %v509_v6 = vmul.f32 %v442_v1, %v109_v52 }
 0x141   :  { %v510_v11 = vmul.f32 %v443_v3, %v113_v57 }
 0x142   :  { %v540_v10 = vadd.f32 %v509_v6, %v508_v7  ;;  %v444_v12 = vadd.f32 %v428_v4, %v400_v5 }
 0x144   :  { %v541_v13 = vadd.f32 %v540_v10, %v510_v11  ;;  %v511_v14 = vmul.f32 %v444_v12, %v117_v8 }
 0x146   :  { %v542_v15 = vadd.f32 %v541_v13, %v511_v14 }
 0x148   :  { %v555_v17 = vrot.slane %v542_v15, 4 }
 0x14a   :  { %v556_v18 = vadd.f32 %v555_v17, %v542_v15 }
 0x14c   :  { %v557_v9 = vrot.slane %v556_v18, 2 }
 0x14e   :  { %v558_v19 = vadd.f32 %v557_v9, %v556_v18 }
 0x150   :  { %v559_v20 = vrot.slane %v558_v19, 1 }
 0x152   :  { %v560_v21 = vadd.f32 %v559_v20, %v558_v19 }
 0x154   :  { %561 = vst [vmem:[%s656_s3] sm:$0xff] %v560_v21 }

</bundles_post_ra>
